<compile_context>
chip_gen: v7x
topology: tpu7x:2x2x1
jax: 0.10.0
libtpu: 0.0.40
codegen_flags: <defaults>
</compile_context>

<pallas_src>
import jax
import jax.numpy as jnp
from jax.experimental import pallas as pl
from jax.experimental.pallas import tpu as pltpu


_VMEM_LIMIT_BYTES = 48 * 1024 * 1024    # safe on v7x (64 MiB/TC), lifts v5e/v6e default
_RESIDENT_W_BUDGET = 24 * 1024 * 1024   # budget for 2x (double-buffered) resident weight
_FAST_PATH_BUDGET = 32 * 1024 * 1024    # total fast-path VMEM footprint budget


def _round_up(x, m):
    return ((x + m - 1) // m) * m


def _cdiv(a, b):
    return (a + b - 1) // b


def _pick_tile_m(m, max_tm):
    """M-tile that is 8-aligned (or == M), prefers no padding, >=2 blocks when cheap."""
    if m <= max_tm:
        if m >= 16 and m % 16 == 0:
            return m // 2            # two blocks for megacore, no padding
        return m                     # single block equal to the full dim, no padding
    nb_min = _cdiv(m, max_tm)
    # Prefer an exact divisor whose quotient is 8-aligned (no padding copy at all).
    for nb in range(nb_min, min(nb_min + 8, m) + 1):
        if m % nb == 0 and (m // nb) % 8 == 0:
            return m // nb
    # Otherwise near-even tiles; pads M up by < 8*nb rows.
    return _round_up(_cdiv(m, nb_min), 8)


# --------------------------------------------------------------------------
# Kernels
# --------------------------------------------------------------------------
def _linear_resident_kernel(x_ref, w_ref, b_ref, o_ref):
    # 1-D grid over M; weight + bias fully resident in VMEM.
    o_ref[...] = (
        jnp.dot(x_ref[...], w_ref[...], preferred_element_type=jnp.float32)
        + b_ref[...]
    ).astype(o_ref.dtype)


def _tiled_f32out_kernel(x_ref, w_ref, b_ref, o_ref):
    # Grid (M//tm, N//tn, K//tk); f32 output accumulates directly into o_ref
    # (resident across the k axis) — no scratch, no extra copy pass.
    @pl.when(pl.program_id(2) == 0)
    def _init():
        o_ref[...] = jnp.broadcast_to(b_ref[...], o_ref.shape)

    o_ref[...] += jnp.dot(x_ref[...], w_ref[...], preferred_element_type=jnp.float32)


def _tiled_acc_kernel(x_ref, w_ref, b_ref, o_ref, acc_ref):
    # Non-f32 output: accumulate in an f32 VMEM scratch, cast once at the end.
    @pl.when(pl.program_id(2) == 0)
    def _init():
        acc_ref[...] = jnp.broadcast_to(b_ref[...], acc_ref.shape)

    acc_ref[...] += jnp.dot(x_ref[...], w_ref[...], preferred_element_type=jnp.float32)

    @pl.when(pl.program_id(2) == pl.num_programs(2) - 1)
    def _fin():
        o_ref[...] = acc_ref[...].astype(o_ref.dtype)


# --------------------------------------------------------------------------
# Wrappers
# --------------------------------------------------------------------------
def _linear_resident(x2d, w, b2d, out_dtype, tile_m):
    """Fast path: 1-D grid over M, weight fully resident in VMEM."""
    M, D_in = x2d.shape
    D_out = w.shape[1]
    M_pad = _round_up(M, tile_m)

    x_in = x2d if M_pad == M else jnp.pad(x2d, ((0, M_pad - M), (0, 0)))
    itemsize = jnp.dtype(x2d.dtype).itemsize

    cost = pl.CostEstimate(
        flops=2 * M_pad * D_in * D_out,
        transcendentals=0,
        bytes_accessed=(
            x_in.size * itemsize
            + w.size * jnp.dtype(w.dtype).itemsize
            + b2d.size * 4
            + M_pad * D_out * jnp.dtype(out_dtype).itemsize
        ),
    )

    out = pl.pallas_call(
        _linear_resident_kernel,
        out_shape=jax.ShapeDtypeStruct((M_pad, D_out), out_dtype),
        grid_spec=pltpu.PrefetchScalarGridSpec(
            num_scalar_prefetch=0,
            grid=(M_pad // tile_m,),
            in_specs=[
                pl.BlockSpec((tile_m, D_in), lambda i: (i, 0)),
                pl.BlockSpec((D_in, D_out), lambda i: (0, 0)),   # resident, fetched once
                pl.BlockSpec((1, D_out), lambda i: (0, 0)),      # resident bias
            ],
            out_specs=pl.BlockSpec((tile_m, D_out), lambda i: (i, 0)),
        ),
        compiler_params=pltpu.CompilerParams(
            dimension_semantics=("parallel",),
            vmem_limit_bytes=_VMEM_LIMIT_BYTES,
        ),
        cost_estimate=cost,
    )(x_in, w, b2d)

    return out if M_pad == M else out[:M]


def _linear_tiled(x2d, w, b2d, out_dtype, max_tm=1024, max_tn=1024, max_tk=512):
    """Fallback: 3-axis tiled GEMM for weights too large to keep resident."""
    M, D_in = x2d.shape
    D_out = w.shape[1]

    # Adaptive tiles: use the full dim when it fits (no padding), otherwise a
    # near-even 128-aligned split (K/N) or 8-aligned split (M).
    if D_in <= max_tk:
        tile_k = D_in
    else:
        tile_k = _round_up(_cdiv(D_in, _cdiv(D_in, max_tk)), 128)
    K_pad = _round_up(D_in, tile_k)

    if D_out <= max_tn:
        tile_n = D_out
    else:
        tile_n = _round_up(_cdiv(D_out, _cdiv(D_out, max_tn)), 128)
    N_pad = _round_up(D_out, tile_n)

    tile_m = _pick_tile_m(M, max_tm)
    if M <= tile_m and D_out <= tile_n and M >= 16:
        # Guarantee >=2 blocks on a parallel axis so both v7x TCs get work.
        tile_m = _round_up(_cdiv(M, 2), 8)
    M_pad = _round_up(M, tile_m)

    # Zero K-padding is exact for the matmul; padded M/N rows/cols are sliced off.
    x_p = x2d if (M_pad, K_pad) == (M, D_in) else jnp.pad(
        x2d, ((0, M_pad - M), (0, K_pad - D_in)))
    w_p = w if (K_pad, N_pad) == (D_in, D_out) else jnp.pad(
        w, ((0, K_pad - D_in), (0, N_pad - D_out)))
    b_p = b2d if N_pad == D_out else jnp.pad(b2d, ((0, 0), (0, N_pad - D_out)))

    grid = (M_pad // tile_m, N_pad // tile_n, K_pad // tile_k)

    itemsize = jnp.dtype(x2d.dtype).itemsize
    out_itemsize = jnp.dtype(out_dtype).itemsize
    cost = pl.CostEstimate(
        flops=2 * M_pad * K_pad * N_pad,
        transcendentals=0,
        bytes_accessed=(
            grid[1] * x_p.size * itemsize                      # x re-read per N tile
            + grid[0] * w_p.size * jnp.dtype(w.dtype).itemsize  # W re-read per M tile
            + grid[0] * b_p.size * 4
            + M_pad * N_pad * out_itemsize
        ),
    )

    if jnp.dtype(out_dtype) == jnp.dtype(jnp.float32):
        kernel, scratch = _tiled_f32out_kernel, []
    else:
        kernel, scratch = _tiled_acc_kernel, [pltpu.VMEM((tile_m, tile_n), jnp.float32)]

    out = pl.pallas_call(
        kernel,
        out_shape=jax.ShapeDtypeStruct((M_pad, N_pad), out_dtype),
        grid_spec=pltpu.PrefetchScalarGridSpec(
            num_scalar_prefetch=0,
            grid=grid,
            in_specs=[
                pl.BlockSpec((tile_m, tile_k), lambda i, j, k: (i, k)),
                pl.BlockSpec((tile_k, tile_n), lambda i, j, k: (k, j)),
                pl.BlockSpec((1, tile_n), lambda i, j, k: (0, j)),
            ],
            out_specs=pl.BlockSpec((tile_m, tile_n), lambda i, j, k: (i, j)),
            scratch_shapes=scratch,
        ),
        compiler_params=pltpu.CompilerParams(
            dimension_semantics=("parallel", "parallel", "arbitrary"),
            vmem_limit_bytes=_VMEM_LIMIT_BYTES,
        ),
        cost_estimate=cost,
    )(x_p, w_p, b_p)

    if (M_pad, N_pad) != (M, D_out):
        out = out[:M, :D_out]
    return out


@jax.jit
def content_encoder_forward(x, weight_t, bias):
    """x: (B, T, D_in); weight_t: (D_in, D_out) [W pre-transposed]; bias: (D_out,).

    Pass bf16 x / weight_t to halve HBM traffic on this memory-bound GEMM;
    accumulation is always f32.
    """
    B, T, D_in = x.shape
    D_out = weight_t.shape[1]
    M = B * T

    x2d = x.reshape(M, D_in)
    b2d = bias.astype(jnp.float32).reshape(1, D_out)   # cast hoisted out of the kernel
    out_dtype = x.dtype

    itemsize = jnp.dtype(x.dtype).itemsize
    w_itemsize = jnp.dtype(weight_t.dtype).itemsize

    # VMEM-resident sizes (layout pads sublanes to 8, lanes to 128).
    K_lane = _round_up(D_in, 128)
    N_lane = _round_up(D_out, 128)
    w_vmem = _round_up(D_in, 8) * N_lane * w_itemsize
    b_vmem = N_lane * 4

    # ---- fast path: weight fully resident in VMEM, 1-D grid over M ----------
    if 2 * w_vmem <= _RESIDENT_W_BUDGET:
        room = _FAST_PATH_BUDGET - 2 * (w_vmem + b_vmem)
        per_row = 2 * (K_lane + N_lane) * itemsize      # double-buffered x + out rows
        tm_cap = (room // per_row) // 8 * 8 if per_row > 0 else 0
        if tm_cap >= 8:
            tile_m = _pick_tile_m(M, max_tm=512)
            if tile_m > tm_cap:
                tile_m = tm_cap
            out2d = _linear_resident(x2d, weight_t, b2d, out_dtype, tile_m)
            return out2d.reshape(B, T, D_out)

    # ---- fallback: tiled 3-axis GEMM for very large weights ------------------
    out2d = _linear_tiled(x2d, weight_t, b2d, out_dtype)
    return out2d.reshape(B, T, D_out)


def init_params(key, input_dim, output_dim, dtype=jnp.float32):
    """Deterministic nn.Linear-style init: U(-1/sqrt(in), 1/sqrt(in))."""
    kw, kb = jax.random.split(key)
    bound = 1.0 / (input_dim ** 0.5)
    # PyTorch stores weight as (out, in); we keep it pre-transposed (in, out).
    weight_t = jax.random.uniform(
        kw, (input_dim, output_dim), dtype=dtype, minval=-bound, maxval=bound
    )
    bias = jax.random.uniform(
        kb, (output_dim,), dtype=dtype, minval=-bound, maxval=bound
    )
    return weight_t, bias


if __name__ == "__main__":
    key = jax.random.PRNGKey(0)
    k_x, k_p, k_x2, k_p2, k_x3, k_p3 = jax.random.split(key, 6)

    # 1) Small shape — weight-resident fast path (two M blocks for megacore).
    batch, seq, d_in, d_out = 2, 8, 32, 64
    x = jax.random.normal(k_x, (batch, seq, d_in), dtype=jnp.float32)
    w_t, b = init_params(k_p, d_in, d_out)
    y = jax.block_until_ready(content_encoder_forward(x, w_t, b))
    y_ref = x @ w_t + b
    assert y.shape == (batch, seq, d_out)
    assert jnp.allclose(y, y_ref, atol=1e-5, rtol=1e-5)

    # 2) Odd, non-128-aligned shape — fast path, no padded copies at all.
    x2 = jax.random.normal(k_x2, (3, 70, 96), dtype=jnp.float32)
    w2, b2 = init_params(k_p2, 96, 200)
    y2 = jax.block_until_ready(content_encoder_forward(x2, w2, b2))
    assert y2.shape == (3, 70, 200)
    assert jnp.allclose(y2, x2 @ w2 + b2, atol=1e-4, rtol=1e-4)

    # 3) Tiled fallback (forced small max tiles) — f32 output, no scratch,
    #    exercises K/N zero-padding + M-tile search + output slice.
    x3 = jax.random.normal(k_x3, (2, 20, 192), dtype=jnp.float32)
    w3, b3 = init_params(k_p3, 192, 200)
    x3_2d = x3.reshape(40, 192)
    y3 = _linear_tiled(x3_2d, w3, b3.reshape(1, 200).astype(jnp.float32),
                       jnp.float32, max_tm=32, max_tn=128, max_tk=128)
    y3 = jax.block_until_ready(y3)
    ref3 = x3_2d @ w3 + b3
    assert y3.shape == (40, 200)
    assert jnp.allclose(y3, ref3, atol=1e-4, rtol=1e-4)

    # 4) Tiled fallback with bf16 output — exercises the f32-accumulator kernel.
    yb = _linear_tiled(x3_2d.astype(jnp.bfloat16), w3.astype(jnp.bfloat16),
                       b3.reshape(1, 200).astype(jnp.float32),
                       jnp.bfloat16, max_tm=32, max_tn=128, max_tk=128)
    yb = jax.block_until_ready(yb)
    assert yb.shape == (40, 200)
    assert jnp.allclose(yb.astype(jnp.float32), ref3, atol=0.06, rtol=0.06)

    print("KERNEL_OK")
</pallas_src>

<mosaic_0001>
module attributes {stable_mosaic.version = 11 : i64} {
  func.func @_linear_resident_kernel(%arg0: i32, %arg1: memref<8x32xf32, #tpu.memory_space<vmem>>, %arg2: memref<32x64xf32, #tpu.memory_space<vmem>>, %arg3: memref<1x64xf32, #tpu.memory_space<vmem>>, %arg4: memref<8x64xf32, #tpu.memory_space<vmem>>) attributes {dimension_semantics = [#tpu.dimension_semantics<parallel>], iteration_bounds = array<i64: 2>, scalar_prefetch = 0 : i64, scratch_operands = 0 : i64, tpu.core_type = #tpu.core_type<tc>, window_params = [{transform_indices = @transform_0, window_bounds = array<i64: 8, 32>}, {pipeline_mode = #tpu.pipeline_mode<synchronous>, transform_indices = @transform_1, window_bounds = array<i64: 32, 64>}, {pipeline_mode = #tpu.pipeline_mode<synchronous>, transform_indices = @transform_2, window_bounds = array<i64: 1, 64>}, {transform_indices = @transform_3, window_bounds = array<i64: 8, 64>}]} {
    %c0 = arith.constant 0 : index
    %c0_0 = arith.constant 0 : index
    %0 = vector.load %arg1[%c0, %c0_0] : memref<8x32xf32, #tpu.memory_space<vmem>>, vector<8x32xf32>
    %c0_1 = arith.constant 0 : index
    %c0_2 = arith.constant 0 : index
    %1 = vector.load %arg2[%c0_1, %c0_2] : memref<32x64xf32, #tpu.memory_space<vmem>>, vector<32x64xf32>
    %cst = arith.constant dense<0.000000e+00> : vector<8x64xf32>
    %2 = tpu.matmul %0, %1, %cst {dimension_numbers = #tpu.dot_dimension_numbers<[1], [0], [0], [1], [0, 0, 1, 1], [], []>} : vector<8x32xf32>, vector<32x64xf32>, vector<8x64xf32> -> vector<8x64xf32>
    %c0_3 = arith.constant 0 : index
    %c0_4 = arith.constant 0 : index
    %3 = vector.load %arg3[%c0_3, %c0_4] : memref<1x64xf32, #tpu.memory_space<vmem>>, vector<1x64xf32>
    %4 = vector.broadcast %3 : vector<1x64xf32> to vector<8x64xf32>
    %5 = arith.addf %2, %4 : vector<8x64xf32>
    %c0_5 = arith.constant 0 : index
    %c0_6 = arith.constant 0 : index
    %6 = vector.load %arg4[%c0_5, %c0_6] : memref<8x64xf32, #tpu.memory_space<vmem>>, vector<8x64xf32>
    tpu.vector_store %arg4[%c0_5, %c0_6], %5 {strides = array<i32>} : memref<8x64xf32, #tpu.memory_space<vmem>>, vector<8x64xf32>,
    return
  }
  func.func @transform_0(%arg0: i32) -> (i32, i32) {
    %c0_i32 = arith.constant 0 : i32
    %c0_i32_0 = arith.constant 0 : i32
    return %arg0, %c0_i32 : i32, i32
  }
  func.func @transform_1(%arg0: i32) -> (i32, i32) {
    %c0_i32 = arith.constant 0 : i32
    %c0_i32_0 = arith.constant 0 : i32
    %c0_i32_1 = arith.constant 0 : i32
    return %c0_i32, %c0_i32_0 : i32, i32
  }
  func.func @transform_2(%arg0: i32) -> (i32, i32) {
    %c0_i32 = arith.constant 0 : i32
    %c0_i32_0 = arith.constant 0 : i32
    %c0_i32_1 = arith.constant 0 : i32
    return %c0_i32, %c0_i32_0 : i32, i32
  }
  func.func @transform_3(%arg0: i32) -> (i32, i32) {
    %c0_i32 = arith.constant 0 : i32
    %c0_i32_0 = arith.constant 0 : i32
    return %arg0, %c0_i32 : i32, i32
  }
}

</mosaic_0001>

<bundles_post_ra>
// kernel: content_encoder_forward.1
= control target key start
LH: loop header
LB: loop body
LE: loop exit
PB: predicated region body
PF: predicated region fallthrough
CT: control target
= control target key end

     0   :  { %8 = vsyncpa [#allocation3], 0  ;;  %s840_s0 = inlined_call_operand.hbm [shape: f32[16,32], index: 0, kind: input, shape index: {}]   ;;  %s841_s1 = inlined_call_operand.hbm [shape: f32[32,64], index: 1, kind: input, shape index: {}]   ;;  %s842_s2 = inlined_call_operand.vmem [shape: f32[1,64], index: 2, kind: input, shape index: {}]   ;;  %s843_s3 = inlined_call_operand.hbm [shape: f32[16,64], index: 3, kind: output, shape index: {}]  }
   0x1   :  { %10 = vsyncpa [#allocation3 + $0x1], 0 }
   0x2   :  { %11 = vsyncpa [#allocation6], 0 }
   0x3   :  { %12 = vsyncpa [#allocation4], 0 }
   0x4   :  { %14 = vsyncpa [#allocation4 + $0x1], 0  ;;  %s641_s12 = smov 0   ;;  %s643_s13 = smov 0  }
   0x5   :  { %s645_s14 = smov 0   ;;  %s647_s15 = smov 0  }
   0x6 LB: > { %s662_s16 = sadd.s32 4294967295, %s611_s15   ;;  %s383_s17 = sadd.s32 4294967294, %s611_s15   ;;  %s611_s15 = sphi %s647_s15, %s863_s15   ;;  %s607_s14 = sphi %s645_s14, %s862_s14   ;;  %s603_s13 = sphi %s643_s13, %s861_s13   ;;  %s599_s12 = sphi %s641_s12, %s860_s12  }
   0x7   : > { %p40_p0 = scmp.ne.s32.totalorder %s603_s13, %s599_s12  ;;  %p844_p1 = scmp.eq.s32.totalorder %s662_s16, 0 }
   0x8   : > { %p112_p3 = scmp.eq.s32.totalorder %s383_s17, 1  ;;  %p384_p5 = scmp.ge.s32.totalorder %s611_s15, 1 }
   0x9   : > { %p671_p4 = por %p844_p1, %p40_p0  ;;  %p119_p7 = scmp.lt.s32.totalorder %s611_s15, 3 }
   0xa   : > { %p676_p6 = por %p112_p3, %p40_p0  ;;  %s613_s21 = smov [#allocation5]  }
   0xb   : > { %s847_s18 = scalar_select %p671_p4, 1, 0 }
   0xc   : > { %s848_s19 = scalar_select %p676_p6, 1, 0 }
   0xd   : > { %p681_p8 = pnand %p384_p5, %p119_p7  ;;  %s131_s22 = sshll.u32 %s613_s21, 4  ;;  %s685_s22 = int_to_ptr.vmem [resolvable:$true] %s131_s22 }
   0xe   : > { %s697_s24 = sadd.s32 1, %s611_s15   ;;  %s27_s25 = sadd.s32 1, %s607_s14 }
   0xf   : > { %s849_s20 = scalar_select %p681_p8, 1, 0 }
  0x10   : > { %p429_p9 = pneg %p681_p8  ;;  %s24_s26 = ssub.s32 %s611_s15, %s697_s24 }
  0x11   : > { %s483_s29 = scalar_lea.hbm %s841_s1, 512 }
  0x12   : > { %p692_p11 = pnand %p429_p9, %p844_p1  ;;  %p484_p12 = scmp.ne.s32.totalorder %s841_s1, %s483_s29 }
  0x13   : > { %p490_p5 = scmp.lt.u32.totalorder %s483_s29, %s841_s1 }
  0x14   : > { %p485_p13 = pneg %p692_p11 }
  0x16   : > { %p486_p0 = pnand %p485_p13, %p484_p12 }
  0x18   : > { %p487_p3 = pneg %p486_p0 }
  0x1a   : > { %p492_p7 = pnand %p490_p5, %p487_p3 }
  0x1c   : > { %495 = shalt.err (!%p492_p7)
}
  0x1d   : > { %s496_s7 = scalar_lea.vmem %s685_s22, 512  ;;  %p504_p2 = scmp.lt.s32.totalorder %s685_s22, %s685_s22 }
  0x1e   : > { %p497_p9 = scmp.ne.s32.totalorder %s685_s22, %s496_s7  ;;  %p505_p6 = scmp.lt.s32.totalorder %s496_s7, %s496_s7 }
  0x20   : > { %p499_p10 = pnand %p497_p9, %p485_p13  ;;  %p506_p4 = por %p505_p6, %p504_p2 }
  0x22   : > { %p500_p1 = pneg %p499_p10 }
  0x24   : > { %p507_p8 = pnand %p506_p4, %p500_p1 }
  0x26   : > { %510 = shalt.err (!%p507_p8)
}
  0x27   : > { %s614_s8 = smov 128   ;;  %s615_s9 = smov 8  }
  0x28   : > { %432 = dma.hbm_to_vmem [thread:$0]  (!%p692_p11), %s841_s1, 512, %s685_s22, [#allocation6], %s614_s8, %s614_s8, %s615_s9  }
  0x29   : > { %p25_p2 = scmp.eq.s32.totalorder %s24_s26, 0  ;;  %p34_p1 = scmp.ne.s32.totalorder %s607_s14, %s603_s13 }
  0x2a   : > { %p35_p4 = scmp.eq.s32.totalorder %s611_s15, 0  ;;  %p442_p6 = scmp.lt.s32.totalorder %s611_s15, 2 }
  0x2b   : > { %s728_s17 = scalar_select %p25_p2, %s607_s14, %s27_s25  }
  0x2c   : > { %p36_p8 = por %p35_p4, %p34_p1  ;;  %p851_p10 = scmp.eq.s32.totalorder %s662_s16, 1 }
  0x2d   : > { %s148_s27 = sand.u32 1, %s607_s14   ;;  %s388_s28 = sshll.u32 %s611_s15, 7 }
  0x2e   : > { %p732_p12 = por %p851_p10, %p34_p1  ;;  %s387_s29 = sshll.u32 %s148_s27, 3 }
  0x2f   : > { %s741_s4 = scalar_lea.hbm %s840_s0, %s388_s28  ;;  %s152_s22 = scalar_lea.vmem [#allocation2], %s387_s29 }
  0x30   : > { %s159_s25 = sshll.u32 %s152_s22, 4  ;;  %p743_p11 = pnand %p442_p6, %p36_p8  ;;  %s747_s25 = int_to_ptr.vmem [resolvable:$true] %s159_s25 }
  0x31   : > { %s149_s5 = scalar_lea.sflag [#allocation3], %s148_s27  ;;  %s511_s6 = scalar_lea.hbm %s741_s4, 128 }
  0x32   : > { %p512_p13 = scmp.ne.s32.totalorder %s741_s4, %s511_s6  ;;  %p513_p0 = pneg %p743_p11 }
  0x33   : > { %s516_s9 = scalar_lea.hbm %s840_s0, 256  ;;  %p517_p7 = scmp.lt.u32.totalorder %s741_s4, %s840_s0 }
  0x34   : > { %p514_p3 = pnand %p513_p0, %p512_p13  ;;  %p518_p9 = scmp.lt.u32.totalorder %s516_s9, %s511_s6 }
  0x35   : > { %p520_p1 = scmp.lt.u32.totalorder %s511_s6, %s741_s4 }
  0x36   : > { %p515_p5 = pneg %p514_p3  ;;  %p519_p2 = por %p518_p9, %p517_p7 }
  0x38   : > { %p521_p4 = por %p520_p1, %p519_p2 }
  0x3a   : > { %p522_p6 = pnand %p521_p4, %p515_p5 }
  0x3c   : > { %525 = shalt.err (!%p522_p6)
}
  0x3d   : > { %s526_s27 = scalar_lea.vmem %s747_s25, 128  ;;  %s616_s28 = smov [#allocation2]  }
  0x3e   : > { %p527_p8 = scmp.ne.s32.totalorder %s747_s25, %s526_s27  ;;  %s531_s29 = sshll.u32 %s616_s28, 4  ;;  %s532_s29 = int_to_ptr.vmem [resolvable:$false] %s531_s29 }
  0x3f   : > { %s533_s23 = scalar_lea.vmem %s532_s29, 256  ;;  %p534_p3 = scmp.lt.s32.totalorder %s747_s25, %s532_s29 }
  0x40   : > { %p529_p10 = pnand %p527_p8, %p513_p0  ;;  %p535_p7 = scmp.lt.s32.totalorder %s533_s23, %s526_s27 }
  0x42   : > { %p530_p13 = pneg %p529_p10  ;;  %p536_p9 = por %p535_p7, %p534_p3 }
  0x44   : > { %p537_p2 = pnand %p536_p9, %p530_p13 }
  0x46   : > { %540 = shalt.err (!%p537_p2)
}
  0x47   : > { %436 = dma.hbm_to_vmem [thread:$0]  (!%p743_p11), %s741_s4, 128, %s747_s25, %s149_s5  }
  0x48   : > { %p854_p5 = scmp.ne.s32.totalorder %s849_s20, 0 }
  0x49   : > { %s777_s30 = sand.u32 (!%p854_p5), 1, %s603_s13   ;;  %p855_p0 = scmp.ne.s32.totalorder (!%p854_p5), %s847_s18, 0 }
  0x4a   : > { %168 = sbr.rel (%p854_p5) target bundleno = 323 (0x143), region = 32  ;;  %s390_s22 = sshll.u32 (!%p854_p5), %s777_s30, 3 }
  0x4b   : > { %s171_s6 = scalar_lea.sflag (!%p854_p5), [#allocation3], %s777_s30  ;;  %s174_s7 = scalar_lea.vmem (!%p854_p5), [#allocation2], %s390_s22 }
  0x51   : > { %586 = dma.done.wait (%p855_p0), %s171_s6, 128  }
  0x52   : > { %588 = vsyncadd (%p855_p0), %s171_s6, 4294967168  ;;  %p856_p1 = scmp.eq.s32.totalorder %s662_s16, 0 }
  0x54   : > { %590 = dma.done.wait (%p856_p1), [#allocation6], 512   ;;  %p857_p11 = pmov %p856_p1 }
  0x55   : > { %v617_v0 = vmov 0.0|0.0   ;;  %vm618_vm0 = vmmov 0   ;;  %v619_v1 = vmov 0.0   ;;  %v202_v2 = vld [vmem:[#allocation5] sm:$0xff]  ;;  %v203_v3 = vld [vmem:[#allocation5 + $0x8] sm:$0xff]  ;;  %v204_v4 = vld [vmem:[#allocation5 + $0x10] sm:$0xff] }
  0x56   : > { %592 = vsyncadd (%p857_p11), [#allocation6], 4294966784  ;;  %415 = vmatprep.subr.bf16.mxu0 %v617_v0  ;;  %412 = vmatprep.mubr.msk.f32.mxu0 %vm618_vm0, %v619_v1  ;;  %v416_v5 = vpack.c.bf16 %v203_v3, %v202_v2  ;;  %v205_v6 = vld [vmem:[#allocation5 + $0x18] sm:$0xff]  ;;  %vm213_vm1 = vcmask 261120   ;;  %v393_v9 = vld [vmem:[%s842_s2] ss:$0 sm:$0xff] }
  0x57   : > { %v419_v7 = vpack.c.bf16 %v205_v6, %v204_v4  ;;  %v201_v8 = vld [vmem:[%s174_s7] sm:$0xff]  ;;  %s396_s4 = sshll.u32 %s662_s16, 7  ;;  %s200_s25 = scalar_lea.vmem [#allocation7], %s390_s22  ;;  %vm287_vm2 = vcmask 523264  }
  0x58   : > { %417 = vmatpush3.bf16.msra.mxu0 %v416_v5  ;;  %s303_s26 = sshll.u32 %s200_s25, 4  ;;  %s796_s9 = scalar_lea.hbm %s843_s3, %s396_s4  ;;  %s798_s26 = int_to_ptr.vmem [resolvable:$true] %s303_s26 }
  0x59   : > { %418 = vmatprep.subr.bf16.mxu0 %v617_v0  ;;  %s290_s10 = scalar_lea.sflag [#allocation4], %s777_s30  ;;  %s541_s11 = scalar_lea.vmem %s798_s26, 128 }
  0x5a   : > { %p542_p4 = scmp.ne.s32.totalorder %s798_s26, %s541_s11  ;;  %s620_s16 = smov [#allocation7]  }
  0x5b   : > { %s545_s27 = sshll.u32 %s620_s16, 4  ;;  %s546_s27 = int_to_ptr.vmem [resolvable:$false] %s545_s27 }
  0x5c   : > { %420 = vmatpush3.bf16.msra.mxu0 %v419_v7  ;;  %p543_p6 = pnand %p542_p4, %p732_p12  ;;  %s547_s28 = scalar_lea.vmem %s546_s27, 256 }
  0x5d   : > { %p548_p10 = scmp.lt.s32.totalorder %s798_s26, %s546_s27  ;;  %p549_p13 = scmp.lt.s32.totalorder %s547_s28, %s541_s11 }
  0x5e   : > { %p544_p8 = pneg %p543_p6 }
  0x5f   : > { %413 = vmatmul.mubr.msk.f32.vlgmr.msra.gmra.mrb[0].mxu0 %vm213_vm1, %v201_v8  ;;  %p550_p3 = por %p549_p13, %p548_p10 }
  0x61   : > { %p551_p7 = pnand %p550_p3, %p544_p8 }
 0x132   : > { %v283_v10 = vpop.f32.mrb[0].mxu0 }
 0x133   : > { %v284_v11 = vadd.f32 %v393_v9, %v283_v10  ;;  %v414_v12 = vpop.f32.mrb[1].mxu0 }
 0x135   : > { %288 = vst.msk [vmem:[%s200_s25] sm:$0xff] %vm287_vm2, %v284_v11 }
 0x136   : > { %554 = shalt.err (!%p551_p7)
}
 0x137   : > { %s555_s29 = scalar_lea.hbm %s796_s9, 128  ;;  %s559_s22 = scalar_lea.hbm %s843_s3, 256 }
 0x138   : > { %p556_p9 = scmp.ne.s32.totalorder %s796_s9, %s555_s29  ;;  %p560_p0 = scmp.lt.u32.totalorder %s796_s9, %s843_s3 }
 0x139   : > { %p561_p1 = scmp.lt.u32.totalorder %s559_s22, %s555_s29  ;;  %p563_p4 = scmp.lt.u32.totalorder %s555_s29, %s796_s9 }
 0x13a   : > { %p557_p2 = pnand %p556_p9, %p732_p12 }
 0x13b   : > { %p562_p11 = por %p561_p1, %p560_p0 }
 0x13c   : > { %p558_p5 = pneg %p557_p2 }
 0x13d   : > { %p564_p6 = por %p563_p4, %p562_p11 }
 0x13f   : > { %p565_p8 = pnand %p564_p6, %p558_p5 }
 0x141   : > { %568 = shalt.err (!%p565_p8)
}
 0x142   : > { %427 = dma.vmem_to_hbm [thread:$0]  (%p732_p12), %s798_s26, 128, %s796_s9, %s290_s10  }
 0x143 PF: > { %s315_s18 = sand.u32 1, %s599_s12   ;;  %p858_p10 = scmp.ne.s32.totalorder %s848_s19, 0 }
 0x144   : > { %p859_p13 = scmp.ge.s32.totalorder %s611_s15, 2  ;;  %s316_s20 = scalar_lea.sflag [#allocation4], %s315_s18 }
 0x146   : > { %p438_p3 = pnand %p859_p13, %p858_p10 }
 0x148   : > { %594 = dma.done.wait (!%p438_p3), %s316_s20, 128  }
 0x149   : > { %596 = vsyncadd (!%p438_p3), %s316_s20, 4294967168  ;;  %p17_p7 = scmp.ge.s32.totalorder %s697_s24, 4   ;;  %s860_s12 = smov %s603_s13 }
 0x14a   : > { %s861_s13 = smov %s607_s14  ;;  %s862_s14 = smov %s728_s17 }
 0x14b   : > { %s863_s15 = smov %s697_s24  ;;  %19 = sbr.rel (!%p17_p7) target bundleno = 6 (0x6), region = 81 }
 0x152   :  { %321 = vsyncpa [#allocation3], 1 }
 0x153   :  { %323 = vsyncpa [#allocation3 + $0x1], 1 }
 0x154   :  { %324 = vsyncpa [#allocation6], 1 }
 0x155   :  { %325 = vsyncpa [#allocation4], 1 }
 0x156   :  { %327 = vsyncpa [#allocation4 + $0x1], 1 }

</bundles_post_ra>
